<compile_context>
chip_gen: v5e
topology: v5e:2x2
jax: 0.10.0
libtpu: 0.0.40
codegen_flags: <defaults>
</compile_context>

<pallas_src>
import jax
import jax.numpy as jnp
from jax.experimental import pallas as pl
from jax.experimental.pallas import tpu as pltpu


def _round_up(x, m):
    return ((x + m - 1) // m) * m


def _dnn_matmul_kernel(x_ref, w_ref, b_ref, o_ref, acc_ref):
    k = pl.program_id(1)

    @pl.when(k == 0)
    def _():
        # Seed the accumulator with the (already folded) bias.
        acc_ref[...] = jnp.broadcast_to(b_ref[...], acc_ref.shape).astype(jnp.float32)

    acc_ref[...] += jnp.dot(
        x_ref[...].astype(w_ref.dtype),
        w_ref[...],
        preferred_element_type=jnp.float32,
    )

    @pl.when(k == pl.num_programs(1) - 1)
    def _():
        o_ref[...] = acc_ref[...].astype(o_ref.dtype)


def fold_batchnorm_into_linear(mean_c, var_c, w, b, hw):
    """Fold (x - mean)/sqrt(var) into a flattened-NCHW linear layer.

    w: (F, num_classes) with F = C*H*W, hw = H*W.  Returns (w_folded, b_folded)
    such that  x_flat @ w_folded + b_folded == ((x - mean)/std).flatten @ w + b.
    Done once at init (mean/var are fixed constants).
    """
    inv_std_c = 1.0 / jnp.sqrt(var_c.astype(jnp.float32))
    inv_std_f = jnp.repeat(inv_std_c, hw)            # (F,)
    mean_f = jnp.repeat(mean_c.astype(jnp.float32), hw)  # (F,)
    w_f32 = w.astype(jnp.float32)
    w_folded = w_f32 * inv_std_f[:, None]
    b_folded = b.astype(jnp.float32) - (mean_f * inv_std_f) @ w_f32
    return w_folded, b_folded


def dnn_forward(x_nchw, w_folded, b_folded, *, tm=None, tk=None,
                weight_dtype=jnp.float32):
    """x_nchw: (N, C, H, W). w_folded: (C*H*W, num_classes). Returns (N, num_classes)."""
    N, C, H, W = x_nchw.shape
    F = C * H * W
    num_classes = w_folded.shape[1]

    # ---- tile sizes -------------------------------------------------------
    # M tile: 128 for real batches, minimum 8 (sublane) for tiny batches.
    if tm is None:
        tm = min(128, _round_up(N, 8))
    # K tile: 512 keeps per-step VMEM tiny (x: tm*tk*4 B, w: tk*128*4 B) even
    # double-buffered, well under v7x's 64 MiB VMEM / default scoped limits.
    if tk is None:
        tk = min(512, _round_up(F, 128))
    m_pad = _round_up(N, tm)
    k_pad = _round_up(F, tk)
    n_pad = _round_up(num_classes, 128)   # lane-dense output

    # ---- pad operands (zeros: padded K rows/cols and N cols contribute 0) --
    x_flat = x_nchw.reshape(N, F).astype(jnp.float32)
    x_p = jnp.pad(x_flat, ((0, m_pad - N), (0, k_pad - F)))
    w_p = jnp.pad(w_folded.astype(weight_dtype),
                  ((0, k_pad - F), (0, n_pad - num_classes)))
    b_p = jnp.pad(b_folded.astype(jnp.float32),
                  (0, n_pad - num_classes)).reshape(1, n_pad)

    grid = (m_pad // tm, k_pad // tk)

    out = pl.pallas_call(
        _dnn_matmul_kernel,
        out_shape=jax.ShapeDtypeStruct((m_pad, n_pad), jnp.float32),
        grid_spec=pltpu.PrefetchScalarGridSpec(
            num_scalar_prefetch=0,
            grid=grid,
            in_specs=[
                pl.BlockSpec((tm, tk), lambda i, k: (i, k)),       # x tile
                pl.BlockSpec((tk, n_pad), lambda i, k: (k, 0)),    # W tile
                pl.BlockSpec((1, n_pad), lambda i, k: (0, 0)),     # bias (resident)
            ],
            out_specs=pl.BlockSpec((tm, n_pad), lambda i, k: (i, 0)),
            scratch_shapes=[pltpu.VMEM((tm, n_pad), jnp.float32)],
        ),
        compiler_params=pltpu.CompilerParams(
            dimension_semantics=("parallel", "arbitrary"),
        ),
    )(x_p, w_p, b_p)

    return out[:N, :num_classes]


if __name__ == "__main__":
    # Small deterministic shapes consistent with the module: NCHW with C=3
    # (the module's mean/var tensors have 3 channels).
    N, C, H, W = 2, 3, 16, 16
    F = C * H * W
    NUM_CLASSES = 10

    key = jax.random.PRNGKey(0)
    kx, kw, kb = jax.random.split(key, 3)

    x = jax.random.normal(kx, (N, C, H, W), dtype=jnp.float32)

    # Fixed ImageNet normalization constants from the module's __init__.
    mean_c = jnp.array([0.485, 0.456, 0.406], dtype=jnp.float32)
    var_c = jnp.array([0.229, 0.224, 0.225], dtype=jnp.float32) ** 2

    # Deterministically initialized inner-model (linear classifier) params.
    w = jax.random.normal(kw, (F, NUM_CLASSES), dtype=jnp.float32) * 0.02
    b = jax.random.normal(kb, (NUM_CLASSES,), dtype=jnp.float32) * 0.01

    # Fold the constant batch_norm into the classifier once (init-time).
    w_folded, b_folded = fold_batchnorm_into_linear(mean_c, var_c, w, b, H * W)

    logits = dnn_forward(x, w_folded, b_folded)
    logits = jax.block_until_ready(logits)

    # Pure-JAX reference of the original module semantics.
    x_norm = (x - mean_c[None, :, None, None]) / jnp.sqrt(
        var_c[None, :, None, None]
    )
    ref = x_norm.reshape(N, F) @ w + b[None, :]
    assert logits.shape == (N, NUM_CLASSES)
    assert jnp.allclose(logits, ref, atol=1e-3, rtol=1e-3)

    print("KERNEL_OK")
</pallas_src>

<mosaic_0001>
module attributes {stable_mosaic.version = 11 : i64} {
  func.func @_dnn_matmul_kernel(%arg0: i32, %arg1: i32, %arg2: memref<8x512xf32, #tpu.memory_space<vmem>>, %arg3: memref<512x128xf32, #tpu.memory_space<vmem>>, %arg4: memref<1x128xf32, #tpu.memory_space<vmem>>, %arg5: memref<8x128xf32, #tpu.memory_space<vmem>>, %arg6: memref<8x128xf32, #tpu.memory_space<vmem>>) attributes {dimension_semantics = [#tpu.dimension_semantics<parallel>, #tpu.dimension_semantics<arbitrary>], iteration_bounds = array<i64: 1, 2>, scalar_prefetch = 0 : i64, scratch_operands = 1 : i64, tpu.core_type = #tpu.core_type<tc>, window_params = [{transform_indices = @transform_0, window_bounds = array<i64: 8, 512>}, {transform_indices = @transform_1, window_bounds = array<i64: 512, 128>}, {pipeline_mode = #tpu.pipeline_mode<synchronous>, transform_indices = @transform_2, window_bounds = array<i64: 1, 128>}, {transform_indices = @transform_3, window_bounds = array<i64: 8, 128>}]} {
    %c0_i32 = arith.constant 0 : i32
    %0 = arith.cmpi eq, %arg1, %c0_i32 : i32
    %1 = arith.extui %0 : i1 to i32
    %c0_i32_0 = arith.constant 0 : i32
    %2 = arith.cmpi ne, %1, %c0_i32_0 : i32
    scf.if %2 {
      %c0_9 = arith.constant 0 : index
      %c0_10 = arith.constant 0 : index
      %12 = vector.load %arg4[%c0_9, %c0_10] : memref<1x128xf32, #tpu.memory_space<vmem>>, vector<1x128xf32>
      %13 = vector.shape_cast %12 : vector<1x128xf32> to vector<1x128xf32>
      %14 = vector.broadcast %13 : vector<1x128xf32> to vector<8x128xf32>
      %c0_11 = arith.constant 0 : index
      %c0_12 = arith.constant 0 : index
      %15 = vector.load %arg6[%c0_11, %c0_12] : memref<8x128xf32, #tpu.memory_space<vmem>>, vector<8x128xf32>
      tpu.vector_store %arg6[%c0_11, %c0_12], %14 {strides = array<i32>} : memref<8x128xf32, #tpu.memory_space<vmem>>, vector<8x128xf32>,
    } else {
    }
    %c0 = arith.constant 0 : index
    %c0_1 = arith.constant 0 : index
    %3 = vector.load %arg6[%c0, %c0_1] : memref<8x128xf32, #tpu.memory_space<vmem>>, vector<8x128xf32>
    %c0_2 = arith.constant 0 : index
    %c0_3 = arith.constant 0 : index
    %4 = vector.load %arg2[%c0_2, %c0_3] : memref<8x512xf32, #tpu.memory_space<vmem>>, vector<8x512xf32>
    %c0_4 = arith.constant 0 : index
    %c0_5 = arith.constant 0 : index
    %5 = vector.load %arg3[%c0_4, %c0_5] : memref<512x128xf32, #tpu.memory_space<vmem>>, vector<512x128xf32>
    %cst = arith.constant dense<0.000000e+00> : vector<8x128xf32>
    %6 = tpu.matmul %4, %5, %cst {dimension_numbers = #tpu.dot_dimension_numbers<[1], [0], [0], [1], [0, 0, 1, 1], [], []>} : vector<8x512xf32>, vector<512x128xf32>, vector<8x128xf32> -> vector<8x128xf32>
    %7 = arith.addf %3, %6 : vector<8x128xf32>
    %c0_6 = arith.constant 0 : index
    %c0_7 = arith.constant 0 : index
    %8 = vector.load %arg6[%c0_6, %c0_7] : memref<8x128xf32, #tpu.memory_space<vmem>>, vector<8x128xf32>
    tpu.vector_store %arg6[%c0_6, %c0_7], %7 {strides = array<i32>} : memref<8x128xf32, #tpu.memory_space<vmem>>, vector<8x128xf32>,
    %c1_i32 = arith.constant 1 : i32
    %9 = arith.cmpi eq, %arg1, %c1_i32 : i32
    %10 = arith.extui %9 : i1 to i32
    %c0_i32_8 = arith.constant 0 : i32
    %11 = arith.cmpi ne, %10, %c0_i32_8 : i32
    scf.if %11 {
      %c0_9 = arith.constant 0 : index
      %c0_10 = arith.constant 0 : index
      %12 = vector.load %arg6[%c0_9, %c0_10] : memref<8x128xf32, #tpu.memory_space<vmem>>, vector<8x128xf32>
      %c0_11 = arith.constant 0 : index
      %c0_12 = arith.constant 0 : index
      %13 = vector.load %arg5[%c0_11, %c0_12] : memref<8x128xf32, #tpu.memory_space<vmem>>, vector<8x128xf32>
      tpu.vector_store %arg5[%c0_11, %c0_12], %12 {strides = array<i32>} : memref<8x128xf32, #tpu.memory_space<vmem>>, vector<8x128xf32>,
    } else {
    }
    return
  }
  func.func @transform_0(%arg0: i32, %arg1: i32) -> (i32, i32) {
    %c0_i32 = arith.constant 0 : i32
    return %arg0, %arg1 : i32, i32
  }
  func.func @transform_1(%arg0: i32, %arg1: i32) -> (i32, i32) {
    %c0_i32 = arith.constant 0 : i32
    %c0_i32_0 = arith.constant 0 : i32
    return %arg1, %c0_i32 : i32, i32
  }
  func.func @transform_2(%arg0: i32, %arg1: i32) -> (i32, i32) {
    %c0_i32 = arith.constant 0 : i32
    %c0_i32_0 = arith.constant 0 : i32
    %c0_i32_1 = arith.constant 0 : i32
    return %c0_i32, %c0_i32_0 : i32, i32
  }
  func.func @transform_3(%arg0: i32, %arg1: i32) -> (i32, i32) {
    %c0_i32 = arith.constant 0 : i32
    %c0_i32_0 = arith.constant 0 : i32
    return %arg0, %c0_i32 : i32, i32
  }
}

</mosaic_0001>

<bundles_post_ra>
// kernel: tpu_custom_call.1
= control target key start
LH: loop header
LB: loop body
LE: loop exit
PB: predicated region body
PF: predicated region fallthrough
CT: control target
= control target key end

     0   :  { %8 = vsyncpa [#allocation4], 0  ;;  %s956_s0 = inlined_call_operand.hbm [shape: f32[8,1024], index: 0, kind: input, shape index: {}]   ;;  %s957_s1 = inlined_call_operand.hbm [shape: f32[1024,128], index: 1, kind: input, shape index: {}]   ;;  %s958_s2 = inlined_call_operand.vmem [shape: f32[1,128], index: 2, kind: input, shape index: {}]   ;;  %s959_s3 = inlined_call_operand.hbm [shape: f32[8,128], index: 3, kind: output, shape index: {}]  }
   0x1   :  { %10 = vsyncpa [#allocation4 + $0x1], 0 }
   0x2   :  { %11 = vsyncpa [#allocation7], 0 }
   0x3   :  { %13 = vsyncpa [#allocation7 + $0x1], 0 }
   0x4   :  { %14 = vsyncpa [#allocation5], 0  ;;  %s767_s12 = smov 0   ;;  %s769_s13 = smov 0  }
   0x5   :  { %s771_s14 = smov 0   ;;  %s773_s15 = smov 0  }
   0x6   :  { %s775_s16 = smov 0   ;;  %s777_s17 = smov 0  }
   0x7 LB: > { %s506_s18 = sadd.s32 4294967295, %s742_s17   ;;  %s29_s19 = sadd.s32 1, %s738_s16  ;;  %s742_s17 = sphi %s777_s17, %s20_s17   ;;  %s738_s16 = sphi %s775_s16, %s967_s16   ;;  %s734_s15 = sphi %s773_s15, %s966_s15   ;;  %s730_s14 = sphi %s771_s14, %s965_s14   ;;  %s726_s13 = sphi %s769_s13, %s964_s13   ;;  %s722_s12 = sphi %s767_s12, %s963_s12  }
   0x8   : > { %p30_p0 = scmp.ge.s32.totalorder %s29_s19, 2  ;;  %s41_s20 = sadd.s32 1, %s730_s14 }
   0x9   : > { %p48_p1 = scmp.ne.s32.totalorder %s730_s14, %s726_s13  ;;  %p49_p2 = scmp.eq.s32.totalorder %s742_s17, 0 }
   0xa   : > { %s969_s19 = smov (%p30_p0, %s29_s19), 0  ;;  %p54_p4 = scmp.ne.s32.totalorder %s726_s13, %s722_s12 }
   0xb   : > { %p803_p3 = por %p49_p2, %p48_p1  ;;  %s37_s22 = ssub.s32 %s738_s16, %s969_s19 }
   0xc   : > { %p55_p5 = scmp.eq.s32.totalorder %s506_s18, 0  ;;  %p39_p6 = scmp.eq.s32.totalorder %s37_s22, 0 }
   0xd   : > { %p541_p8 = scmp.lt.s32.totalorder %s742_s17, 2  ;;  %s821_s25 = sand.u32 1, %s730_s14  }
   0xe   : > { %p812_p7 = por %p55_p5, %p54_p4  ;;  %s524_s26 = sshll.u32 %s738_s16, 5 }
   0xf   : > { %s818_s24 = scalar_select %p39_p6, %s730_s14, %s41_s20  }
  0x10   : > { %s509_s27 = sshll.u32 %s821_s25, 5  ;;  %s165_s30 = scalar_lea.hbm %s956_s0, %s524_s26 }
  0x11   : > { %s167_s4 = sshll.u32 %s165_s30, 4  ;;  %s158_s5 = scalar_lea.vmem [#allocation3], %s509_s27  ;;  %s168_s4 = int_to_ptr.hbm [resolvable:$true] %s167_s4 }
  0x12   : > { %s169_s6 = sshll.u32 %s158_s5, 4  ;;  %p830_p9 = pnand %p541_p8, %p803_p3  ;;  %s170_s6 = int_to_ptr.vmem [resolvable:$true] %s169_s6 }
  0x13   : > { %p515_p10 = scmp.ge.s32.totalorder %s742_s17, 1  ;;  %p196_p11 = scmp.lt.s32.totalorder %s742_s17, 3 }
  0x14   : > { %s512_s8 = sshll.u32 %s821_s25, 9  ;;  %s155_s9 = scalar_lea.sflag [#allocation4], %s821_s25 }
  0x15   : > { %537 = dma.hbm_to_vmem [thread:$0]  (!%p830_p9), %s168_s4, 512, %s170_s6, %s155_s9  }
  0x16   : > { %p197_p12 = pnand %p515_p10, %p196_p11  ;;  %s525_s10 = sshll.u32 %s738_s16, 9 }
  0x17   : > { %s180_s11 = scalar_lea.vmem [#allocation6], %s512_s8  ;;  %s185_s21 = scalar_lea.hbm %s957_s1, %s525_s10 }
  0x18   : > { %s188_s12 = sshll.u32 %s180_s11, 4  ;;  %s186_s26 = sshll.u32 %s185_s21, 4  ;;  %s189_s12 = int_to_ptr.vmem [resolvable:$true] %s188_s12  ;;  %s187_s26 = int_to_ptr.hbm [resolvable:$true] %s186_s26 }
  0x19   : > { %s177_s27 = scalar_lea.sflag [#allocation7], %s821_s25  ;;  %s744_s28 = smov 128  }
  0x1a   : > { %s745_s29 = smov 8   ;;  %200 = sbr.rel (%p197_p12) target bundleno = 230 (0xe6), region = 32 }
  0x1b   : > { %540 = dma.hbm_to_vmem [thread:$0]  (!%p830_p9), %s187_s26, 8192, %s189_s12, %s177_s27, %s744_s28, %s744_s28, %s745_s29  }
  0x1c   : > { %s202_s30 = sand.u32 (!%p197_p12), 1, %s726_s13  }
  0x1d   : > { %s516_s4 = sshll.u32 (!%p197_p12), %s202_s30, 5  ;;  %s203_s5 = scalar_lea.sflag (!%p197_p12), [#allocation4], %s202_s30 }
  0x1e   : > { %s848_s6 = scalar_lea.vmem (!%p197_p12), [#allocation3], %s516_s4 }
  0x1f   : > { %709 = dma.done.wait (%p812_p7), %s203_s5, 512  }
  0x20   : > { %711 = vsyncadd (%p812_p7), %s203_s5, 4294966784  ;;  %s517_s8 = sshll.u32 %s202_s30, 9  ;;  %s213_s25 = scalar_lea.sflag [#allocation7], %s202_s30 }
  0x21   : > { %s854_s9 = scalar_lea.vmem [#allocation6], %s517_s8 }
  0x22   : > { %713 = dma.done.wait (%p812_p7), %s213_s25, 8192  }
  0x23   : > { %715 = vsyncadd (%p812_p7), %s213_s25, 4294959104  ;;  %p518_p13 = scmp.ne.s32.totalorder %s734_s15, 0 }
  0x25   : > { %245 = sbr.rel (%p518_p13) target bundleno = 44 (0x2c), region = 44 }
  0x2a   : > { %v595_v0 = vld [vmem:[%s958_s2] ss:$0 sm:$0xff] }
  0x2b   : > { %250 = vst [vmem:[#allocation2] sm:$0xff] %v595_v0 }
  0x2c PF: > { %v303_v1 = vld [vmem:[%s854_s9 + $0x178] sm:$0xff]  ;;  %v302_v2 = vld [vmem:[%s854_s9 + $0x170] sm:$0xff]  ;;  %v301_v6 = vld [vmem:[%s854_s9 + $0x168] sm:$0xff]  ;;  %p519_p0 = scmp.ne.s32.totalorder %s734_s15, 1 }
  0x2d   : > { %v319_v3 = vld [vmem:[%s854_s9 + $0x1f8] sm:$0xff]  ;;  %360 = vmatpush.msra.mxu2 %v303_v1  ;;  %v318_v7 = vld [vmem:[%s854_s9 + $0x1f0] sm:$0xff]  ;;  %v317_v10 = vld [vmem:[%s854_s9 + $0x1e8] sm:$0xff] }
  0x2e   : > { %380 = vmatpush.msra.mxu3 %v319_v3  ;;  %v271_v4 = vld [vmem:[%s854_s9 + $0x78] sm:$0xff]  ;;  %v270_v8 = vld [vmem:[%s854_s9 + $0x70] sm:$0xff]  ;;  %v269_v11 = vld [vmem:[%s854_s9 + $0x68] sm:$0xff] }
  0x2f   : > { %v287_v5 = vld [vmem:[%s854_s9 + $0xf8] sm:$0xff]  ;;  %320 = vmatpush.msra.mxu0 %v271_v4  ;;  %v286_v9 = vld [vmem:[%s854_s9 + $0xf0] sm:$0xff]  ;;  %361 = vmatpush.msra.mxu2 %v302_v2  ;;  %v300_v12 = vld [vmem:[%s854_s9 + $0x160] sm:$0xff] }
  0x30   : > { %340 = vmatpush.msra.mxu1 %v287_v5  ;;  %381 = vmatpush.msra.mxu3 %v318_v7  ;;  %v285_v13 = vld [vmem:[%s854_s9 + $0xe8] sm:$0xff]  ;;  %v316_v14 = vld [vmem:[%s854_s9 + $0x1e0] sm:$0xff]  ;;  %v299_v17 = vld [vmem:[%s854_s9 + $0x158] sm:$0xff] }
  0x31   : > { %321 = vmatpush.msra.mxu0 %v270_v8  ;;  %362 = vmatpush.msra.mxu2 %v301_v6  ;;  %v268_v15 = vld [vmem:[%s854_s9 + $0x60] sm:$0xff]  ;;  %v315_v18 = vld [vmem:[%s854_s9 + $0x1d8] sm:$0xff]  ;;  %v298_v21 = vld [vmem:[%s854_s9 + $0x150] sm:$0xff] }
  0x32   : > { %341 = vmatpush.msra.mxu1 %v286_v9  ;;  %382 = vmatpush.msra.mxu3 %v317_v10  ;;  %v284_v16 = vld [vmem:[%s854_s9 + $0xe0] sm:$0xff]  ;;  %v267_v19 = vld [vmem:[%s854_s9 + $0x58] sm:$0xff]  ;;  %v314_v22 = vld [vmem:[%s854_s9 + $0x1d0] sm:$0xff] }
  0x33   : > { %322 = vmatpush.msra.mxu0 %v269_v11  ;;  %363 = vmatpush.msra.mxu2 %v300_v12  ;;  %v283_v20 = vld [vmem:[%s854_s9 + $0xd8] sm:$0xff]  ;;  %v266_v23 = vld [vmem:[%s854_s9 + $0x50] sm:$0xff]  ;;  %v297_v25 = vld [vmem:[%s854_s9 + $0x148] sm:$0xff] }
  0x34   : > { %342 = vmatpush.msra.mxu1 %v285_v13  ;;  %383 = vmatpush.msra.mxu3 %v316_v14  ;;  %v282_v24 = vld [vmem:[%s854_s9 + $0xd0] sm:$0xff]  ;;  %v313_v26 = vld [vmem:[%s854_s9 + $0x1c8] sm:$0xff]  ;;  %v296_v29 = vld [vmem:[%s854_s9 + $0x140] sm:$0xff] }
  0x35   : > { %323 = vmatpush.msra.mxu0 %v268_v15  ;;  %364 = vmatpush.msra.mxu2 %v299_v17  ;;  %v265_v27 = vld [vmem:[%s854_s9 + $0x48] sm:$0xff]  ;;  %v312_v30 = vld [vmem:[%s854_s9 + $0x1c0] sm:$0xff]  ;;  %v295_v33 = vld [vmem:[%s854_s9 + $0x138] sm:$0xff] }
  0x36   : > { %343 = vmatpush.msra.mxu1 %v284_v16  ;;  %384 = vmatpush.msra.mxu3 %v315_v18  ;;  %v281_v28 = vld [vmem:[%s854_s9 + $0xc8] sm:$0xff]  ;;  %v264_v31 = vld [vmem:[%s854_s9 + $0x40] sm:$0xff]  ;;  %v311_v34 = vld [vmem:[%s854_s9 + $0x1b8] sm:$0xff] }
  0x37   : > { %324 = vmatpush.msra.mxu0 %v267_v19  ;;  %365 = vmatpush.msra.mxu2 %v298_v21  ;;  %v280_v32 = vld [vmem:[%s854_s9 + $0xc0] sm:$0xff]  ;;  %v263_v35 = vld [vmem:[%s854_s9 + $0x38] sm:$0xff]  ;;  %v294_v37 = vld [vmem:[%s854_s9 + $0x130] sm:$0xff] }
  0x38   : > { %344 = vmatpush.msra.mxu1 %v283_v20  ;;  %385 = vmatpush.msra.mxu3 %v314_v22  ;;  %v279_v36 = vld [vmem:[%s854_s9 + $0xb8] sm:$0xff]  ;;  %v310_v38 = vld [vmem:[%s854_s9 + $0x1b0] sm:$0xff]  ;;  %v293_v41 = vld [vmem:[%s854_s9 + $0x128] sm:$0xff] }
  0x39   : > { %325 = vmatpush.msra.mxu0 %v266_v23  ;;  %366 = vmatpush.msra.mxu2 %v297_v25  ;;  %v262_v39 = vld [vmem:[%s854_s9 + $0x30] sm:$0xff]  ;;  %v309_v42 = vld [vmem:[%s854_s9 + $0x1a8] sm:$0xff]  ;;  %v292_v45 = vld [vmem:[%s854_s9 + $0x120] sm:$0xff] }
  0x3a   : > { %345 = vmatpush.msra.mxu1 %v282_v24  ;;  %386 = vmatpush.msra.mxu3 %v313_v26  ;;  %v278_v40 = vld [vmem:[%s854_s9 + $0xb0] sm:$0xff]  ;;  %v261_v43 = vld [vmem:[%s854_s9 + $0x28] sm:$0xff]  ;;  %v308_v46 = vld [vmem:[%s854_s9 + $0x1a0] sm:$0xff] }
  0x3b   : > { %326 = vmatpush.msra.mxu0 %v265_v27  ;;  %367 = vmatpush.msra.mxu2 %v296_v29  ;;  %v277_v44 = vld [vmem:[%s854_s9 + $0xa8] sm:$0xff]  ;;  %v260_v47 = vld [vmem:[%s854_s9 + $0x20] sm:$0xff]  ;;  %v291_v49 = vld [vmem:[%s854_s9 + $0x118] sm:$0xff] }
  0x3c   : > { %346 = vmatpush.msra.mxu1 %v281_v28  ;;  %387 = vmatpush.msra.mxu3 %v312_v30  ;;  %v276_v48 = vld [vmem:[%s854_s9 + $0xa0] sm:$0xff]  ;;  %v307_v50 = vld [vmem:[%s854_s9 + $0x198] sm:$0xff]  ;;  %v290_v53 = vld [vmem:[%s854_s9 + $0x110] sm:$0xff] }
  0x3d   : > { %327 = vmatpush.msra.mxu0 %v264_v31  ;;  %368 = vmatpush.msra.mxu2 %v295_v33  ;;  %v259_v51 = vld [vmem:[%s854_s9 + $0x18] sm:$0xff]  ;;  %v306_v54 = vld [vmem:[%s854_s9 + $0x190] sm:$0xff]  ;;  %v289_v57 = vld [vmem:[%s854_s9 + $0x108] sm:$0xff] }
  0x3e   : > { %347 = vmatpush.msra.mxu1 %v280_v32  ;;  %388 = vmatpush.msra.mxu3 %v311_v34  ;;  %v275_v52 = vld [vmem:[%s854_s9 + $0x98] sm:$0xff]  ;;  %v258_v55 = vld [vmem:[%s854_s9 + $0x10] sm:$0xff]  ;;  %v305_v58 = vld [vmem:[%s854_s9 + $0x188] sm:$0xff] }
  0x3f   : > { %328 = vmatpush.msra.mxu0 %v263_v35  ;;  %369 = vmatpush.msra.mxu2 %v294_v37  ;;  %v274_v56 = vld [vmem:[%s854_s9 + $0x90] sm:$0xff]  ;;  %v257_v59 = vld [vmem:[%s854_s9 + $0x8] sm:$0xff]  ;;  %v288_v61 = vld [vmem:[%s854_s9 + $0x100] sm:$0xff] }
  0x40   : > { %348 = vmatpush.msra.mxu1 %v279_v36  ;;  %389 = vmatpush.msra.mxu3 %v310_v38  ;;  %v273_v60 = vld [vmem:[%s854_s9 + $0x88] sm:$0xff]  ;;  %v304_v62 = vld [vmem:[%s854_s9 + $0x180] sm:$0xff]  ;;  %v254_v63 = vld [vmem:[%s848_s6 + $0x10] sm:$0xff] }
  0x41   : > { %329 = vmatpush.msra.mxu0 %v262_v39  ;;  %370 = vmatpush.msra.mxu2 %v293_v41  ;;  %v255_v0 = vld [vmem:[%s848_s6 + $0x18] sm:$0xff]  ;;  %v256_v1 = vld [vmem:[%s854_s9] sm:$0xff]  ;;  %v253_v4 = vld [vmem:[%s848_s6 + $0x8] sm:$0xff] }
  0x42   : > { %349 = vmatpush.msra.mxu1 %v278_v40  ;;  %390 = vmatpush.msra.mxu3 %v309_v42  ;;  %v272_v2 = vld [vmem:[%s854_s9 + $0x80] sm:$0xff]  ;;  %v251_v11 = vld [vmem:[#allocation2] sm:$0xff] }
  0x43   : > { %330 = vmatpush.msra.mxu0 %v261_v43  ;;  %371 = vmatpush.msra.mxu2 %v292_v45  ;;  %v252_v3 = vld [vmem:[%s848_s6] sm:$0xff] }
  0x44   : > { %350 = vmatpush.msra.mxu1 %v277_v44  ;;  %391 = vmatpush.msra.mxu3 %v308_v46 }
  0x45   : > { %331 = vmatpush.msra.mxu0 %v260_v47  ;;  %372 = vmatpush.msra.mxu2 %v291_v49 }
  0x46   : > { %351 = vmatpush.msra.mxu1 %v276_v48  ;;  %392 = vmatpush.msra.mxu3 %v307_v50 }
  0x47   : > { %332 = vmatpush.msra.mxu0 %v259_v51  ;;  %373 = vmatpush.msra.mxu2 %v290_v53 }
  0x48   : > { %352 = vmatpush.msra.mxu1 %v275_v52  ;;  %393 = vmatpush.msra.mxu3 %v306_v54 }
  0x49   : > { %333 = vmatpush.msra.mxu0 %v258_v55  ;;  %374 = vmatpush.msra.mxu2 %v289_v57 }
  0x4a   : > { %353 = vmatpush.msra.mxu1 %v274_v56  ;;  %394 = vmatpush.msra.mxu3 %v305_v58 }
  0x4b   : > { %334 = vmatpush.msra.mxu0 %v257_v59  ;;  %375 = vmatpush.msra.mxu2 %v288_v61 }
  0x4c   : > { %354 = vmatpush.msra.mxu1 %v273_v60  ;;  %395 = vmatpush.msra.mxu3 %v304_v62 }
  0x4d   : > { %376 = vmatmul.f32.vlgmr.msra.gmra.mxu2 %v254_v63  ;;  %396 = vmatmul.f32.vlgmr.msra.gmra.mxu3 %v255_v0 }
  0x4e   : > { %335 = vmatpush.msra.mxu0 %v256_v1  ;;  %355 = vmatpush.msra.mxu1 %v272_v2 }
  0x4f   : > { %336 = vmatmul.f32.vlgmr.msra.gmra.mxu0 %v252_v3  ;;  %356 = vmatmul.f32.vlgmr.msra.gmra.mxu1 %v253_v4 }
  0xcc   : > { %v337_v5 = vpop.f32.mrf.mxu0  ;;  %v357_v6 = vpop.f32.mrf.mxu1 }
  0xcd   : > { %v358_v7 = vadd.f32 %v357_v6, %v337_v5 }
  0xd0   : > { %v377_v8 = vpop.f32.mrf.mxu2  ;;  %v397_v9 = vpop.f32.mrf.mxu3 }
  0xd1   : > { %v378_v10 = vadd.f32 %v377_v8, %v358_v7 }
  0xd3   : > { %v398_v12 = vadd.f32 %v397_v9, %v378_v10  ;;  %405 = sbr.rel (%p519_p0) target bundleno = 224 (0xe0), region = 48 }
  0xd5   : > { %v400_v13 = vadd.f32 %v398_v12, %v251_v11 }
  0xd7   : > { %401 = vst [vmem:[#allocation2] sm:$0xff] %v400_v13 }
  0xde   : > { %v406_v14 = vld [vmem:[#allocation2] sm:$0xff] }
  0xdf   : > { %407 = vst [vmem:[#allocation8] sm:$0xff] %v406_v14 }
  0xe0 PF: > { %p542_p1 = scmp.eq.s32.totalorder %s506_s18, 1  ;;  %s418_s12 = sshll.u32 %s959_s3, 4  ;;  %s419_s12 = int_to_ptr.hbm [resolvable:$true] %s418_s12 }
  0xe1   : > { %s746_s20 = smov [#allocation8]  }
  0xe2   : > { %s416_s22 = sshll.u32 %s746_s20, 4  ;;  %s417_s22 = int_to_ptr.vmem [resolvable:$true] %s416_s22 }
  0xe3   : > { %531 = dma.vmem_to_hbm [thread:$0]  (%p542_p1), %s417_s22, 128, %s419_s12, [#allocation5]  }
  0xe4   : > { %717 = dma.done.wait (%p542_p1), [#allocation5], 128  }
  0xe5   : > { %719 = vsyncadd (%p542_p1), [#allocation5], 4294967168 }
  0xe6 PF: > { %s20_s17 = sadd.s32 1, %s742_s17   ;;  %s963_s12 = smov %s726_s13 }
  0xe7   : > { %p17_p2 = scmp.ge.s32.totalorder %s20_s17, 4   ;;  %s964_s13 = smov %s730_s14 }
  0xe8   : > { %s965_s14 = smov %s818_s24  ;;  %s966_s15 = smov %s738_s16 }
  0xe9   : > { %s967_s16 = smov %s969_s19  ;;  %19 = sbr.rel (!%p17_p2) target bundleno = 7 (0x7), region = 91 }
  0xee   :  { %432 = vsyncpa [#allocation4], 1 }
  0xef   :  { %434 = vsyncpa [#allocation4 + $0x1], 1 }
  0xf0   :  { %435 = vsyncpa [#allocation7], 1 }
  0xf1   :  { %437 = vsyncpa [#allocation7 + $0x1], 1 }
  0xf2   :  { %438 = vsyncpa [#allocation5], 1 }
  0xf3   :  { %440 = vsyncpa [#allocation5 + $0x1], 1 }

</bundles_post_ra>
